<compile_context>
chip_gen: v6e
topology: v6e:2x2x1
jax: 0.10.0
libtpu: 0.0.40
codegen_flags: <defaults>
</compile_context>

<pallas_src>
import jax
import jax.numpy as jnp
from jax.experimental import pallas as pl
from jax.experimental.pallas import tpu as pltpu

KERNEL_SIZE = 3
PADDING = 1


# ----------------------------------------------------------------------------
# Fused Pallas kernel: 3x (Conv1d(k=3,p=1) + folded-BN + ReLU), single call.
# ----------------------------------------------------------------------------
def fused_conv_blocks_kernel(x_ref, sprev_ref, snext_ref,
                             w1_ref, s1_ref, b1_ref,
                             w2_ref, s2_ref, b2_ref,
                             w3_ref, s3_ref, b3_ref,
                             o_ref):
    # x_ref:                (B*L, Cin)    f32, channels-last, batch-major rows
    # sprev_ref/snext_ref:  (B*L, B*L)    bf16 banded 0/1 shift matrices
    #                                     (encode per-sequence zero padding)
    # wN_ref:               (3, CinN, CoutN) bf16 conv taps (tap-major)
    # sN_ref, bN_ref:       (1, CoutN)    f32 folded BN scale / bias
    # o_ref:                (B*L, Cout3)  f32
    s_prev = sprev_ref[...]
    s_next = snext_ref[...]

    def conv_bn_relu(h_f32, w_ref, scale_ref, bias_ref):
        h = h_f32.astype(jnp.bfloat16)                       # MXU operands in bf16
        # Halo rows (x[l-1], x[l+1]) with zero padding at sequence edges, built
        # on the MXU via exact 0/1 banded matmuls (no concat/roll relayouts).
        h_prev = jnp.dot(s_prev, h,
                         preferred_element_type=jnp.float32).astype(jnp.bfloat16)
        h_next = jnp.dot(s_next, h,
                         preferred_element_type=jnp.float32).astype(jnp.bfloat16)
        # Three shifted taps -> three MXU matmuls, f32 accumulation.
        acc = jnp.dot(h_prev, w_ref[0], preferred_element_type=jnp.float32)
        acc = acc + jnp.dot(h, w_ref[1], preferred_element_type=jnp.float32)
        acc = acc + jnp.dot(h_next, w_ref[2], preferred_element_type=jnp.float32)
        # Folded BatchNorm (inference) + ReLU epilogue, all in f32 on the VPU.
        return jnp.maximum(acc * scale_ref[...] + bias_ref[...], 0.0)

    h1 = conv_bn_relu(x_ref[...], w1_ref, s1_ref, b1_ref)    # (B*L, 32)  stays on-chip
    h2 = conv_bn_relu(h1, w2_ref, s2_ref, b2_ref)            # (B*L, 64)  stays on-chip
    h3 = conv_bn_relu(h2, w3_ref, s3_ref, b3_ref)            # (B*L, 128)
    o_ref[...] = h3.astype(o_ref.dtype)                      # lane-dense 128-ch store


def _make_shift_matrices(batch, length, dtype=jnp.bfloat16):
    """Banded 0/1 matrices: (prev @ h)[r] = h[r-1] (0 at sequence start),
    (next @ h)[r] = h[r+1] (0 at sequence end) — i.e. the conv's zero padding."""
    n = batch * length
    r = jnp.arange(n)
    pos = r % length
    prev = ((r[:, None] - 1 == r[None, :]) & (pos[:, None] != 0)).astype(dtype)
    nxt = ((r[:, None] + 1 == r[None, :]) & (pos[:, None] != length - 1)).astype(dtype)
    return prev, nxt


# ----------------------------------------------------------------------------
# Wrapper: ConvolutionalBlocks forward (PyTorch NCL in / NCL out)
# ----------------------------------------------------------------------------
def convolutional_blocks_forward(x_ncl, params):
    """x_ncl: (B, Cin, L) like PyTorch NCL.  Returns (B, Cout_last, L)."""
    B, c_in, L = x_ncl.shape
    (w1, s1, b1), (w2, s2, b2), (w3, s3, b3) = params
    c_out = w3.shape[2]

    # NCL -> channels-last with batch folded into the matmul M dim: (B*L, Cin).
    # TODO(synk): at production sizes, fold these tiny boundary transposes into the
    # kernel's DMA/index_map and tile L with a halo across a ("parallel",...) grid.
    x_flat = jnp.transpose(x_ncl, (0, 2, 1)).reshape(B * L, c_in)
    s_prev, s_next = _make_shift_matrices(B, L)

    in_specs = [pl.BlockSpec(memory_space=pltpu.MemorySpace.VMEM) for _ in range(12)]
    out_specs = pl.BlockSpec(memory_space=pltpu.MemorySpace.VMEM)

    y_flat = pl.pallas_call(
        fused_conv_blocks_kernel,
        out_shape=jax.ShapeDtypeStruct((B * L, c_out), jnp.float32),
        in_specs=in_specs,
        out_specs=out_specs,
    )(
        x_flat, s_prev, s_next,
        w1.astype(jnp.bfloat16), s1, b1,
        w2.astype(jnp.bfloat16), s2, b2,
        w3.astype(jnp.bfloat16), s3, b3,
    )
    return jnp.transpose(y_flat.reshape(B, L, c_out), (0, 2, 1))   # -> (B, Cout, L)


# ----------------------------------------------------------------------------
# Parameter construction (deterministic, PyTorch-default-like init)
# ----------------------------------------------------------------------------
def make_block_params(key, c_in, c_out, kernel_size=KERNEL_SIZE, eps=1e-5):
    k_w, k_b, k_g, k_be, k_m, k_v = jax.random.split(key, 6)
    fan_in = c_in * kernel_size
    bound = 1.0 / jnp.sqrt(jnp.float32(fan_in))
    # Conv1d weight in PyTorch is (Cout, Cin, K); we store tap-major (K, Cin, Cout).
    w_oik = jax.random.uniform(k_w, (c_out, c_in, kernel_size),
                               minval=-bound, maxval=bound, dtype=jnp.float32)
    w_kio = jnp.transpose(w_oik, (2, 1, 0))                       # (K, Cin, Cout)
    conv_b = jax.random.uniform(k_b, (c_out,), minval=-bound, maxval=bound,
                                dtype=jnp.float32)
    # BatchNorm1d (inference): deterministic non-trivial stats/affine params.
    gamma = 1.0 + 0.1 * jax.random.normal(k_g, (c_out,), dtype=jnp.float32)
    beta = 0.1 * jax.random.normal(k_be, (c_out,), dtype=jnp.float32)
    run_mean = 0.05 * jax.random.normal(k_m, (c_out,), dtype=jnp.float32)
    run_var = 1.0 + 0.1 * jax.random.uniform(k_v, (c_out,), dtype=jnp.float32)
    # Fold conv bias + BN into per-channel scale/bias.
    scale = gamma / jnp.sqrt(run_var + eps)                       # (Cout,)
    bias = beta + (conv_b - run_mean) * scale                     # (Cout,)
    return w_kio, scale.reshape(1, c_out), bias.reshape(1, c_out)


# Pure-JAX reference (correctness check only).  matmul_dtype=bf16 mirrors the
# kernel's bf16-operand / f32-accumulate math exactly.
def reference_forward(x_ncl, params, matmul_dtype=jnp.float32,
                      kernel_size=KERNEL_SIZE, padding=PADDING):
    x = jnp.transpose(x_ncl, (0, 2, 1))
    for (w_kio, scale, bias) in params:
        B, L, _ = x.shape
        xp = jnp.pad(x, ((0, 0), (padding, padding), (0, 0)))
        xp = xp.astype(matmul_dtype).astype(jnp.float32)
        w = w_kio.astype(matmul_dtype).astype(jnp.float32)
        y = sum(jnp.einsum("bli,io->blo", xp[:, k:k + L, :], w[k],
                           preferred_element_type=jnp.float32)
                for k in range(kernel_size))
        x = jnp.maximum(y * scale[0] + bias[0], 0.0)
    return jnp.transpose(x, (0, 2, 1))


if __name__ == "__main__":
    # Small shapes: batch=2, in_channels=4, sample_length=16,
    # out_channels=[32, 64, 128], kernel=3, stride=1, padding=1.
    B, C_IN, L = 2, 4, 16
    OUT_CHANNELS = [32, 64, 128]

    key = jax.random.PRNGKey(0)
    k_x, k_p1, k_p2, k_p3 = jax.random.split(key, 4)
    x = jax.random.normal(k_x, (B, C_IN, L), dtype=jnp.float32)

    params = []
    c_prev = C_IN
    for c_out, kp in zip(OUT_CHANNELS, (k_p1, k_p2, k_p3)):
        params.append(make_block_params(kp, c_prev, c_out))
        c_prev = c_out

    out = convolutional_blocks_forward(x, params)
    out = jax.block_until_ready(out)
    assert out.shape == (B, OUT_CHANNELS[-1], L), out.shape

    # Tight check vs a reference that mirrors the kernel math (bf16 operands,
    # f32 accumulation / epilogue).
    ref_bf16 = jax.block_until_ready(
        reference_forward(x, params, matmul_dtype=jnp.bfloat16))
    assert jnp.allclose(out, ref_bf16, atol=1e-3, rtol=1e-3), \
        float(jnp.max(jnp.abs(out - ref_bf16)))

    # Loose check vs the pure-f32 reference (tolerance loosened for bf16 MXU
    # operands, per review guidance).
    ref_f32 = jax.block_until_ready(reference_forward(x, params))
    assert jnp.allclose(out, ref_f32, atol=5e-2, rtol=5e-2), \
        float(jnp.max(jnp.abs(out - ref_f32)))

    print("KERNEL_OK")
</pallas_src>

<mosaic_0001>
module attributes {stable_mosaic.version = 11 : i64} {
  func.func @fused_conv_blocks_kernel(%arg0: memref<32x4xf32, #tpu.memory_space<vmem>>, %arg1: memref<32x32xbf16, #tpu.memory_space<vmem>>, %arg2: memref<32x32xbf16, #tpu.memory_space<vmem>>, %arg3: memref<3x4x32xbf16, #tpu.memory_space<vmem>>, %arg4: memref<1x32xf32, #tpu.memory_space<vmem>>, %arg5: memref<1x32xf32, #tpu.memory_space<vmem>>, %arg6: memref<3x32x64xbf16, #tpu.memory_space<vmem>>, %arg7: memref<1x64xf32, #tpu.memory_space<vmem>>, %arg8: memref<1x64xf32, #tpu.memory_space<vmem>>, %arg9: memref<3x64x128xbf16, #tpu.memory_space<vmem>>, %arg10: memref<1x128xf32, #tpu.memory_space<vmem>>, %arg11: memref<1x128xf32, #tpu.memory_space<vmem>>, %arg12: memref<32x128xf32, #tpu.memory_space<vmem>>) attributes {dimension_semantics = [], scalar_prefetch = 0 : i64, scratch_operands = 0 : i64, tpu.core_type = #tpu.core_type<tc>} {
    %c0 = arith.constant 0 : index
    %c0_0 = arith.constant 0 : index
    %0 = vector.load %arg1[%c0, %c0_0] : memref<32x32xbf16, #tpu.memory_space<vmem>>, vector<32x32xbf16>
    %c0_1 = arith.constant 0 : index
    %c0_2 = arith.constant 0 : index
    %1 = vector.load %arg2[%c0_1, %c0_2] : memref<32x32xbf16, #tpu.memory_space<vmem>>, vector<32x32xbf16>
    %c0_3 = arith.constant 0 : index
    %c0_4 = arith.constant 0 : index
    %2 = vector.load %arg0[%c0_3, %c0_4] : memref<32x4xf32, #tpu.memory_space<vmem>>, vector<32x4xf32>
    %3 = arith.truncf %2 : vector<32x4xf32> to vector<32x4xbf16>
    %cst = arith.constant dense<0.000000e+00> : vector<32x4xf32>
    %4 = tpu.matmul %0, %3, %cst {dimension_numbers = #tpu.dot_dimension_numbers<[1], [0], [0], [1], [0, 0, 1, 1], [], []>} : vector<32x32xbf16>, vector<32x4xbf16>, vector<32x4xf32> -> vector<32x4xf32>
    %5 = arith.truncf %4 : vector<32x4xf32> to vector<32x4xbf16>
    %cst_5 = arith.constant dense<0.000000e+00> : vector<32x4xf32>
    %6 = tpu.matmul %1, %3, %cst_5 {dimension_numbers = #tpu.dot_dimension_numbers<[1], [0], [0], [1], [0, 0, 1, 1], [], []>} : vector<32x32xbf16>, vector<32x4xbf16>, vector<32x4xf32> -> vector<32x4xf32>
    %7 = arith.truncf %6 : vector<32x4xf32> to vector<32x4xbf16>
    %c0_6 = arith.constant 0 : index
    %c0_7 = arith.constant 0 : index
    %c0_8 = arith.constant 0 : index
    %8 = vector.load %arg3[%c0_6, %c0_7, %c0_8] : memref<3x4x32xbf16, #tpu.memory_space<vmem>>, vector<1x4x32xbf16>
    %9 = vector.shape_cast %8 : vector<1x4x32xbf16> to vector<4x32xbf16>
    %cst_9 = arith.constant dense<0.000000e+00> : vector<32x32xf32>
    %10 = tpu.matmul %5, %9, %cst_9 {dimension_numbers = #tpu.dot_dimension_numbers<[1], [0], [0], [1], [0, 0, 1, 1], [], []>} : vector<32x4xbf16>, vector<4x32xbf16>, vector<32x32xf32> -> vector<32x32xf32>
    %c1 = arith.constant 1 : index
    %c0_10 = arith.constant 0 : index
    %c0_11 = arith.constant 0 : index
    %11 = vector.load %arg3[%c1, %c0_10, %c0_11] : memref<3x4x32xbf16, #tpu.memory_space<vmem>>, vector<1x4x32xbf16>
    %12 = vector.shape_cast %11 : vector<1x4x32xbf16> to vector<4x32xbf16>
    %cst_12 = arith.constant dense<0.000000e+00> : vector<32x32xf32>
    %13 = tpu.matmul %3, %12, %cst_12 {dimension_numbers = #tpu.dot_dimension_numbers<[1], [0], [0], [1], [0, 0, 1, 1], [], []>} : vector<32x4xbf16>, vector<4x32xbf16>, vector<32x32xf32> -> vector<32x32xf32>
    %14 = arith.addf %10, %13 : vector<32x32xf32>
    %c2 = arith.constant 2 : index
    %c0_13 = arith.constant 0 : index
    %c0_14 = arith.constant 0 : index
    %15 = vector.load %arg3[%c2, %c0_13, %c0_14] : memref<3x4x32xbf16, #tpu.memory_space<vmem>>, vector<1x4x32xbf16>
    %16 = vector.shape_cast %15 : vector<1x4x32xbf16> to vector<4x32xbf16>
    %cst_15 = arith.constant dense<0.000000e+00> : vector<32x32xf32>
    %17 = tpu.matmul %7, %16, %cst_15 {dimension_numbers = #tpu.dot_dimension_numbers<[1], [0], [0], [1], [0, 0, 1, 1], [], []>} : vector<32x4xbf16>, vector<4x32xbf16>, vector<32x32xf32> -> vector<32x32xf32>
    %18 = arith.addf %14, %17 : vector<32x32xf32>
    %c0_16 = arith.constant 0 : index
    %c0_17 = arith.constant 0 : index
    %19 = vector.load %arg4[%c0_16, %c0_17] : memref<1x32xf32, #tpu.memory_space<vmem>>, vector<1x32xf32>
    %20 = vector.broadcast %19 : vector<1x32xf32> to vector<32x32xf32>
    %21 = arith.mulf %18, %20 : vector<32x32xf32>
    %c0_18 = arith.constant 0 : index
    %c0_19 = arith.constant 0 : index
    %22 = vector.load %arg5[%c0_18, %c0_19] : memref<1x32xf32, #tpu.memory_space<vmem>>, vector<1x32xf32>
    %23 = vector.broadcast %22 : vector<1x32xf32> to vector<32x32xf32>
    %24 = arith.addf %21, %23 : vector<32x32xf32>
    %cst_20 = arith.constant 0.000000e+00 : f32
    %25 = vector.broadcast %cst_20 : f32 to vector<32x32xf32>
    %26 = arith.maximumf %24, %25 : vector<32x32xf32>
    %27 = arith.truncf %26 : vector<32x32xf32> to vector<32x32xbf16>
    %cst_21 = arith.constant dense<0.000000e+00> : vector<32x32xf32>
    %28 = tpu.matmul %0, %27, %cst_21 {dimension_numbers = #tpu.dot_dimension_numbers<[1], [0], [0], [1], [0, 0, 1, 1], [], []>} : vector<32x32xbf16>, vector<32x32xbf16>, vector<32x32xf32> -> vector<32x32xf32>
    %29 = arith.truncf %28 : vector<32x32xf32> to vector<32x32xbf16>
    %cst_22 = arith.constant dense<0.000000e+00> : vector<32x32xf32>
    %30 = tpu.matmul %1, %27, %cst_22 {dimension_numbers = #tpu.dot_dimension_numbers<[1], [0], [0], [1], [0, 0, 1, 1], [], []>} : vector<32x32xbf16>, vector<32x32xbf16>, vector<32x32xf32> -> vector<32x32xf32>
    %31 = arith.truncf %30 : vector<32x32xf32> to vector<32x32xbf16>
    %c0_23 = arith.constant 0 : index
    %c0_24 = arith.constant 0 : index
    %c0_25 = arith.constant 0 : index
    %32 = vector.load %arg6[%c0_23, %c0_24, %c0_25] : memref<3x32x64xbf16, #tpu.memory_space<vmem>>, vector<1x32x64xbf16>
    %33 = vector.shape_cast %32 : vector<1x32x64xbf16> to vector<32x64xbf16>
    %cst_26 = arith.constant dense<0.000000e+00> : vector<32x64xf32>
    %34 = tpu.matmul %29, %33, %cst_26 {dimension_numbers = #tpu.dot_dimension_numbers<[1], [0], [0], [1], [0, 0, 1, 1], [], []>} : vector<32x32xbf16>, vector<32x64xbf16>, vector<32x64xf32> -> vector<32x64xf32>
    %c1_27 = arith.constant 1 : index
    %c0_28 = arith.constant 0 : index
    %c0_29 = arith.constant 0 : index
    %35 = vector.load %arg6[%c1_27, %c0_28, %c0_29] : memref<3x32x64xbf16, #tpu.memory_space<vmem>>, vector<1x32x64xbf16>
    %36 = vector.shape_cast %35 : vector<1x32x64xbf16> to vector<32x64xbf16>
    %cst_30 = arith.constant dense<0.000000e+00> : vector<32x64xf32>
    %37 = tpu.matmul %27, %36, %cst_30 {dimension_numbers = #tpu.dot_dimension_numbers<[1], [0], [0], [1], [0, 0, 1, 1], [], []>} : vector<32x32xbf16>, vector<32x64xbf16>, vector<32x64xf32> -> vector<32x64xf32>
    %38 = arith.addf %34, %37 : vector<32x64xf32>
    %c2_31 = arith.constant 2 : index
    %c0_32 = arith.constant 0 : index
    %c0_33 = arith.constant 0 : index
    %39 = vector.load %arg6[%c2_31, %c0_32, %c0_33] : memref<3x32x64xbf16, #tpu.memory_space<vmem>>, vector<1x32x64xbf16>
    %40 = vector.shape_cast %39 : vector<1x32x64xbf16> to vector<32x64xbf16>
    %cst_34 = arith.constant dense<0.000000e+00> : vector<32x64xf32>
    %41 = tpu.matmul %31, %40, %cst_34 {dimension_numbers = #tpu.dot_dimension_numbers<[1], [0], [0], [1], [0, 0, 1, 1], [], []>} : vector<32x32xbf16>, vector<32x64xbf16>, vector<32x64xf32> -> vector<32x64xf32>
    %42 = arith.addf %38, %41 : vector<32x64xf32>
    %c0_35 = arith.constant 0 : index
    %c0_36 = arith.constant 0 : index
    %43 = vector.load %arg7[%c0_35, %c0_36] : memref<1x64xf32, #tpu.memory_space<vmem>>, vector<1x64xf32>
    %44 = vector.broadcast %43 : vector<1x64xf32> to vector<32x64xf32>
    %45 = arith.mulf %42, %44 : vector<32x64xf32>
    %c0_37 = arith.constant 0 : index
    %c0_38 = arith.constant 0 : index
    %46 = vector.load %arg8[%c0_37, %c0_38] : memref<1x64xf32, #tpu.memory_space<vmem>>, vector<1x64xf32>
    %47 = vector.broadcast %46 : vector<1x64xf32> to vector<32x64xf32>
    %48 = arith.addf %45, %47 : vector<32x64xf32>
    %cst_39 = arith.constant 0.000000e+00 : f32
    %49 = vector.broadcast %cst_39 : f32 to vector<32x64xf32>
    %50 = arith.maximumf %48, %49 : vector<32x64xf32>
    %51 = arith.truncf %50 : vector<32x64xf32> to vector<32x64xbf16>
    %cst_40 = arith.constant dense<0.000000e+00> : vector<32x64xf32>
    %52 = tpu.matmul %0, %51, %cst_40 {dimension_numbers = #tpu.dot_dimension_numbers<[1], [0], [0], [1], [0, 0, 1, 1], [], []>} : vector<32x32xbf16>, vector<32x64xbf16>, vector<32x64xf32> -> vector<32x64xf32>
    %53 = arith.truncf %52 : vector<32x64xf32> to vector<32x64xbf16>
    %cst_41 = arith.constant dense<0.000000e+00> : vector<32x64xf32>
    %54 = tpu.matmul %1, %51, %cst_41 {dimension_numbers = #tpu.dot_dimension_numbers<[1], [0], [0], [1], [0, 0, 1, 1], [], []>} : vector<32x32xbf16>, vector<32x64xbf16>, vector<32x64xf32> -> vector<32x64xf32>
    %55 = arith.truncf %54 : vector<32x64xf32> to vector<32x64xbf16>
    %c0_42 = arith.constant 0 : index
    %c0_43 = arith.constant 0 : index
    %c0_44 = arith.constant 0 : index
    %56 = vector.load %arg9[%c0_42, %c0_43, %c0_44] : memref<3x64x128xbf16, #tpu.memory_space<vmem>>, vector<1x64x128xbf16>
    %57 = vector.shape_cast %56 : vector<1x64x128xbf16> to vector<64x128xbf16>
    %cst_45 = arith.constant dense<0.000000e+00> : vector<32x128xf32>
    %58 = tpu.matmul %53, %57, %cst_45 {dimension_numbers = #tpu.dot_dimension_numbers<[1], [0], [0], [1], [0, 0, 1, 1], [], []>} : vector<32x64xbf16>, vector<64x128xbf16>, vector<32x128xf32> -> vector<32x128xf32>
    %c1_46 = arith.constant 1 : index
    %c0_47 = arith.constant 0 : index
    %c0_48 = arith.constant 0 : index
    %59 = vector.load %arg9[%c1_46, %c0_47, %c0_48] : memref<3x64x128xbf16, #tpu.memory_space<vmem>>, vector<1x64x128xbf16>
    %60 = vector.shape_cast %59 : vector<1x64x128xbf16> to vector<64x128xbf16>
    %cst_49 = arith.constant dense<0.000000e+00> : vector<32x128xf32>
    %61 = tpu.matmul %51, %60, %cst_49 {dimension_numbers = #tpu.dot_dimension_numbers<[1], [0], [0], [1], [0, 0, 1, 1], [], []>} : vector<32x64xbf16>, vector<64x128xbf16>, vector<32x128xf32> -> vector<32x128xf32>
    %62 = arith.addf %58, %61 : vector<32x128xf32>
    %c2_50 = arith.constant 2 : index
    %c0_51 = arith.constant 0 : index
    %c0_52 = arith.constant 0 : index
    %63 = vector.load %arg9[%c2_50, %c0_51, %c0_52] : memref<3x64x128xbf16, #tpu.memory_space<vmem>>, vector<1x64x128xbf16>
    %64 = vector.shape_cast %63 : vector<1x64x128xbf16> to vector<64x128xbf16>
    %cst_53 = arith.constant dense<0.000000e+00> : vector<32x128xf32>
    %65 = tpu.matmul %55, %64, %cst_53 {dimension_numbers = #tpu.dot_dimension_numbers<[1], [0], [0], [1], [0, 0, 1, 1], [], []>} : vector<32x64xbf16>, vector<64x128xbf16>, vector<32x128xf32> -> vector<32x128xf32>
    %66 = arith.addf %62, %65 : vector<32x128xf32>
    %c0_54 = arith.constant 0 : index
    %c0_55 = arith.constant 0 : index
    %67 = vector.load %arg10[%c0_54, %c0_55] : memref<1x128xf32, #tpu.memory_space<vmem>>, vector<1x128xf32>
    %68 = vector.broadcast %67 : vector<1x128xf32> to vector<32x128xf32>
    %69 = arith.mulf %66, %68 : vector<32x128xf32>
    %c0_56 = arith.constant 0 : index
    %c0_57 = arith.constant 0 : index
    %70 = vector.load %arg11[%c0_56, %c0_57] : memref<1x128xf32, #tpu.memory_space<vmem>>, vector<1x128xf32>
    %71 = vector.broadcast %70 : vector<1x128xf32> to vector<32x128xf32>
    %72 = arith.addf %69, %71 : vector<32x128xf32>
    %cst_58 = arith.constant 0.000000e+00 : f32
    %73 = vector.broadcast %cst_58 : f32 to vector<32x128xf32>
    %74 = arith.maximumf %72, %73 : vector<32x128xf32>
    %c0_59 = arith.constant 0 : index
    %c0_60 = arith.constant 0 : index
    %75 = vector.load %arg12[%c0_59, %c0_60] : memref<32x128xf32, #tpu.memory_space<vmem>>, vector<32x128xf32>
    tpu.vector_store %arg12[%c0_59, %c0_60], %74 {strides = array<i32>} : memref<32x128xf32, #tpu.memory_space<vmem>>, vector<32x128xf32>,
    return
  }
}

</mosaic_0001>

<bundles_post_ra>
// kernel: tpu_custom_call.1
= control target key start
LH: loop header
LB: loop body
LE: loop exit
PB: predicated region body
PF: predicated region fallthrough
CT: control target
= control target key end

     0   :  { %17 = vsyncpa [#allocation3], 0  ;;  %s1729_s0 = inlined_call_operand.vmem [shape: f32[32,4], index: 0, kind: input, shape index: {}]   ;;  %s1730_s1 = inlined_call_operand.vmem [shape: bf16[32,32], index: 1, kind: input, shape index: {}]   ;;  %s1731_s2 = inlined_call_operand.vmem [shape: bf16[32,32], index: 2, kind: input, shape index: {}]   ;;  %s1732_s3 = inlined_call_operand.vmem [shape: bf16[3,4,32], index: 3, kind: input, shape index: {}]   ;;  %s1733_s4 = inlined_call_operand.vmem [shape: f32[1,32], index: 4, kind: input, shape index: {}]   ;;  %s1734_s5 = inlined_call_operand.vmem [shape: f32[1,32], index: 5, kind: input, shape index: {}]   ;;  %s1735_s6 = inlined_call_operand.hbm [shape: bf16[3,32,64], index: 6, kind: input, shape index: {}]   ;;  %s1736_s7 = inlined_call_operand.vmem [shape: f32[1,64], index: 7, kind: input, shape index: {}]   ;;  %s1737_s8 = inlined_call_operand.vmem [shape: f32[1,64], index: 8, kind: input, shape index: {}]   ;;  %s1738_s9 = inlined_call_operand.hbm [shape: bf16[3,64,128], index: 9, kind: input, shape index: {}]   ;;  %s1739_s10 = inlined_call_operand.vmem [shape: f32[1,128], index: 10, kind: input, shape index: {}]   ;;  %s1740_s11 = inlined_call_operand.vmem [shape: f32[1,128], index: 11, kind: input, shape index: {}]   ;;  %s1741_s12 = inlined_call_operand.hbm [shape: f32[32,128], index: 12, kind: output, shape index: {}]  }
   0x1   :  { %18 = vsyncpa [#allocation6], 0 }
   0x2   :  { %19 = vsyncpa [#allocation4], 0  ;;  %s1547_s21 = smov [#allocation2]  }
   0x3   :  { %s37_s22 = sshll.u32 %s1547_s21, 4  ;;  %s38_s22 = int_to_ptr.vmem [resolvable:$true] %s37_s22 }
   0x4   :  { %s1489_s23 = scalar_lea.vmem %s38_s22, 768  ;;  %p1494_p1 = scmp.lt.s32.totalorder %s38_s22, %s38_s22 }
   0x5   :  { %p1490_p0 = scmp.ne.s32.totalorder %s38_s22, %s1489_s23  ;;  %p1495_p2 = scmp.lt.s32.totalorder %s1489_s23, %s1489_s23 }
   0x7   :  { %p1496_p3 = por %p1495_p2, %p1494_p1 }
   0x9   :  { %p1497_p4 = pnand %p1496_p3, %p1490_p0 }
   0xb   :  { %1500 = shalt.err (!%p1497_p4)
}
   0xc   :  { %s1548_s24 = smov 64   ;;  %s1549_s25 = smov 4  }
   0xd   :  { %43 = dma.hbm_to_vmem [thread:$0]  %s1735_s6, 768, %s38_s22, [#allocation3], %s1548_s24, %s1548_s24, %s1549_s25  }
   0xe   :  { %s1550_s28 = smov [#allocation5]  }
   0xf   :  { %s53_s29 = sshll.u32 %s1550_s28, 4  ;;  %s54_s29 = int_to_ptr.vmem [resolvable:$true] %s53_s29 }
  0x10   :  { %s1509_s30 = scalar_lea.vmem %s54_s29, 1536  ;;  %p1514_p6 = scmp.lt.s32.totalorder %s54_s29, %s54_s29 }
  0x11   :  { %p1510_p5 = scmp.ne.s32.totalorder %s54_s29, %s1509_s30  ;;  %p1515_p7 = scmp.lt.s32.totalorder %s1509_s30, %s1509_s30 }
  0x13   :  { %p1516_p8 = por %p1515_p7, %p1514_p6 }
  0x15   :  { %p1517_p9 = pnand %p1516_p8, %p1510_p5 }
  0x17   :  { %1520 = shalt.err (!%p1517_p9)
}
  0x18   :  { %59 = dma.hbm_to_vmem [thread:$0]  %s1738_s9, 1536, %s54_s29, [#allocation6], %s1548_s24, %s1548_s24, %s1549_s25  }
  0x19   :  { %1541 = dma.done.wait [#allocation3], 768  }
  0x1a   :  { %1542 = vsyncadd [#allocation3], 4294966528 }
  0x1b   :  { %1543 = dma.done.wait [#allocation6], 1536  }
  0x1c   :  { %1544 = vsyncadd [#allocation6], 4294965760  ;;  %v81_v0 = vld [vmem:[%s1729_s0 + $0x10] sm:$0xff]  ;;  %v82_v1 = vld [vmem:[%s1729_s0 + $0x18] sm:$0xff]  ;;  %vm95_vm0 = vcmask 261120   ;;  %vm230_vm1 = vcmask 1041408  }
  0x1d   :  { %v79_v2 = vld [vmem:[%s1729_s0] sm:$0xff]  ;;  %v84_v3 = vpack.c.bf16 %v82_v1, %v81_v0  ;;  %v80_v4 = vld [vmem:[%s1729_s0 + $0x8] sm:$0xff]  ;;  %vm223_vm2 = vcmask 31744   ;;  %v1463_v0 = vld [vmem:[#allocation2 + $0x18] sm:$0xff]   ;;  %vm925_vm3 = vcmask 523264  }
  0x1e   :  { %v83_v5 = vpack.c.bf16 %v80_v4, %v79_v2  ;;  %v1640_v6 = vld [vmem:[%s1730_s1] sm:$0xff]   ;;  %v1647_v7 = vld [vmem:[%s1730_s1 + $0x8] sm:$0xff]   ;;  %v1464_v1 = vld [vmem:[#allocation2 + $0x10] sm:$0xff]  }
  0x1f   :  { %1323 = vmatprep.subr.bf16.mxu1 %v84_v3  ;;  %1327 = vmatprep.mubr.msk.bf16.mxu1 %vm95_vm0, %v1640_v6  ;;  %v1652_v8 = vld [vmem:[%s1731_s2] sm:$0xff]   ;;  %v1661_v9 = vld [vmem:[%s1731_s2 + $0x8] sm:$0xff]  }
  0x20   :  { %1324 = vmatpush3.bf16.msra.mxu1 %v84_v3  ;;  %v1208_v10 = vld [vmem:[%s1732_s3 + $0x2] sm:$0x3]  ;;  %1341 = vmatprep.mubr.msk.bf16.mxu0 %vm223_vm2, %v83_v5  ;;  %v220_v12 = vld [vmem:[%s1732_s3] sm:$0x3]  ;;  %v1213_v14 = vld [vmem:[%s1732_s3 + $0x4] sm:$0x3] }
  0x21   :  { %1325 = vmatprep.subr.bf16.mxu1 %v83_v5  ;;  %1449 = vmatprep.subr.msk.bf16.mxu0 %vm230_vm1, %v1208_v10  ;;  %v232_v11 = vsel %vm230_vm1, %v1208_v10, 0  ;;  %v290_v13 = vsel %vm230_vm1, %v220_v12, 0  ;;  %v350_v15 = vsel %vm230_vm1, %v1213_v14, 0  ;;  %v1216_v37 = vld [vmem:[%s1733_s4] ss:$0 sm:$0xff]  ;;  %v1465_v2 = vld [vmem:[#allocation2 + $0x8] sm:$0xff]  }
  0x22   :  { %1340 = vmatpush3.bf16.msra.mxu0 %v232_v11  ;;  %v1217_v45 = vld [vmem:[%s1734_s5] ss:$0 sm:$0xff] }
  0x23   :  { %1451 = vmatprep.subr.msk.bf16.mxu0 %vm230_vm1, %v1213_v14  ;;  %v1467_v4 = vld [vmem:[#allocation2] sm:$0xff]  }
  0x24   :  { %1326 = vmatpush3.bf16.msra.mxu1 %v83_v5 }
  0x25   :  { %1331 = vmatprep.subr.bf16.mxu1 %v84_v3  ;;  %1342 = vmatmul.mubr.msk.bf16.vlgmr.msra.gmra.mxu0 %vm223_vm2, %v84_v3 }
  0x26   :  { %1352 = vmatpush3.bf16.msra.mxu0 %v350_v15 }
  0x27   :  { %1328 = vmatmul.mubr.msk.bf16.vlgmr.msra.gmra.mxu1 %vm95_vm0, %v1647_v7 }
  0x28   :  { %1332 = vmatpush3.bf16.msra.mxu1 %v84_v3  ;;  %1335 = vmatprep.mubr.msk.bf16.mxu1 %vm95_vm0, %v1652_v8  ;;  %v1466_v3 = vld [vmem:[#allocation2 + $0x28] sm:$0xff]  }
  0x29   :  { %1333 = vmatprep.subr.bf16.mxu1 %v83_v5 }
  0x2c   :  { %1334 = vmatpush3.bf16.msra.mxu1 %v83_v5  ;;  %v1468_v5 = vld [vmem:[#allocation2 + $0x20] sm:$0xff]  }
  0x2d   :  { %1450 = vmatprep.subr.msk.bf16.mxu1 %vm230_vm1, %v220_v12 }
  0x2f   :  { %1336 = vmatmul.mubr.msk.bf16.vlgmr.msra.gmra.mxu1 %vm95_vm0, %v1661_v9 }
  0x30   :  { %1346 = vmatpush3.bf16.msra.mxu1 %v290_v13 }
  0xe5   :  { %v1343_v28 = vpop.f32.mrf.mxu0 }
  0xe7   :  { %v1329_v16 = vpop.f32.mrf.mxu1  ;;  %v268_v29 = vpop.f32.mrf.mxu0 }
  0xe9   :  { %v136_v17 = vpop.f32.mrf.mxu1  ;;  %v1344_v31 = vpop.f32.mrf.mxu0 }
  0xeb   :  { %v1330_v18 = vpop.f32.mrf.mxu1  ;;  %v271_v33 = vpop.f32.mrf.mxu0 }
  0xec   :  { %v152_v21 = vpack.c.bf16 %v1330_v18, %v1329_v16 }
  0xed   :  { %v139_v19 = vpop.f32.mrf.mxu1 }
  0xee   :  { %v151_v20 = vpack.c.bf16 %v139_v19, %v136_v17 }
  0xef   :  { %v1337_v22 = vpop.f32.mrf.mxu1 }
  0xf0   :  { %1347 = vmatprep.mubr.msk.bf16.mxu1 %vm223_vm2, %v151_v20 }
  0xf1   :  { %v203_v23 = vpop.f32.mrf.mxu1  ;;  %1348 = vmatmul.mubr.msk.bf16.vlgmr.msra.gmra.mxu1 %vm223_vm2, %v152_v21 }
  0xf2   :  { %1361 = vmatprep.mubr.msk.bf16.mxu1 %vm95_vm0, %v1640_v6 }
  0xf3   :  { %v1338_v24 = vpop.f32.mrf.mxu1 }
  0xf4   :  { %v219_v27 = vpack.c.bf16 %v1338_v24, %v1337_v22 }
  0xf5   :  { %v206_v25 = vpop.f32.mrf.mxu1 }
  0xf6   :  { %v218_v26 = vpack.c.bf16 %v206_v25, %v203_v23 }
  0xf8   :  { %1353 = vmatprep.mubr.msk.bf16.mxu0 %vm223_vm2, %v218_v26 }
  0xf9   :  { %1354 = vmatmul.mubr.msk.bf16.vlgmr.msra.gmra.mxu0 %vm223_vm2, %v219_v27 }
  0xfa   :  { %1369 = vmatprep.mubr.msk.bf16.mxu0 %vm95_vm0, %v1652_v8 }
 0x1b1   :  { %v1349_v30 = vpop.f32.mrf.mxu1 }
 0x1b2   :  { %v335_v35 = vadd.f32 %v1349_v30, %v1343_v28 }
 0x1b3   :  { %v326_v32 = vpop.f32.mrf.mxu1 }
 0x1b4   :  { %v327_v38 = vadd.f32 %v326_v32, %v268_v29  ;;  %v1234_v29 = vld [vmem:[%s1736_s7] ss:$0 sm:$0xff] }
 0x1b5   :  { %v1350_v34 = vpop.f32.mrf.mxu1 }
 0x1b6   :  { %v338_v42 = vadd.f32 %v1350_v34, %v1344_v31 }
 0x1b7   :  { %v329_v40 = vpop.f32.mrf.mxu1 }
 0x1b8   :  { %v330_v47 = vadd.f32 %v329_v40, %v271_v33 }
 0x1b9   :  { %v1355_v36 = vpop.f32.mrf.mxu0 }
 0x1ba   :  { %v403_v39 = vadd.f32 %v1355_v36, %v335_v35 }
 0x1bb   :  { %v386_v41 = vpop.f32.mrf.mxu0 }
 0x1bc   :  { %v414_v43 = vmul.f32 %v1216_v37, %v403_v39  ;;  %v401_v44 = vadd.f32 %v386_v41, %v327_v38 }
 0x1bd   :  { %v1356_v46 = vpop.f32.mrf.mxu0 }
 0x1be   :  { %v412_v48 = vmul.f32 %v1216_v37, %v401_v44  ;;  %v404_v49 = vadd.f32 %v1356_v46, %v338_v42  ;;  %v425_v51 = vadd.f32 %v1217_v45, %v414_v43 }
 0x1bf   :  { %v389_v50 = vpop.f32.mrf.mxu0 }
 0x1c0   :  { %v415_v52 = vmul.f32 %v1216_v37, %v404_v49  ;;  %v402_v53 = vadd.f32 %v389_v50, %v330_v47  ;;  %v423_v54 = vadd.f32 %v1217_v45, %v412_v48  ;;  %v429_v57 = vmax.f32 %v425_v51, 0.0 }
 0x1c2   :  { %v426_v55 = vadd.f32 %v1217_v45, %v415_v52  ;;  %v413_v56 = vmul.f32 %v1216_v37, %v402_v53  ;;  %v427_v60 = vmax.f32 %v423_v54, 0.0  ;;  %v1235_v37 = vld [vmem:[%s1737_s8] ss:$0 sm:$0xff] }
 0x1c4   :  { %v430_v58 = vmax.f32 %v426_v55, 0.0  ;;  %v424_v59 = vadd.f32 %v1217_v45, %v413_v56  ;;  %v1469_v56 = vld [vmem:[#allocation5 + $0x38] sm:$0xff]  }
 0x1c6   :  { %v432_v61 = vpack.c.bf16 %v430_v58, %v429_v57  ;;  %v428_v62 = vmax.f32 %v424_v59, 0.0  ;;  %v1473_v57 = vld [vmem:[#allocation5 + $0x18] sm:$0xff]   ;;  %v1470_v58 = vld [vmem:[#allocation5 + $0x30] sm:$0xff]  }
 0x1c7   :  { %v1475_v59 = vld [vmem:[#allocation5 + $0x10] sm:$0xff]  }
 0x1c8   :  { %v431_v63 = vpack.c.bf16 %v428_v62, %v427_v60  ;;  %1357 = vmatprep.subr.bf16.mxu1 %v432_v61  ;;  %1365 = vmatprep.subr.bf16.mxu0 %v432_v61  ;;  %v1471_v60 = vld [vmem:[#allocation5 + $0x28] sm:$0xff]   ;;  %v1474_v62 = vld [vmem:[#allocation5 + $0x58] sm:$0xff]  }
 0x1c9   :  { %1358 = vmatpush3.bf16.msra.mxu1 %v432_v61  ;;  %1366 = vmatpush3.bf16.msra.mxu0 %v432_v61 }
 0x1ca   :  { %1359 = vmatprep.subr.bf16.mxu1 %v431_v63  ;;  %1367 = vmatprep.subr.bf16.mxu0 %v431_v63 }
 0x1cd   :  { %1360 = vmatpush3.bf16.msra.mxu1 %v431_v63  ;;  %1368 = vmatpush3.bf16.msra.mxu0 %v431_v63 }
 0x1ce   :  { %1373 = vmatprep.subr.bf16.mxu1 %v1463_v0  ;;  %1381 = vmatprep.subr.bf16.mxu0 %v1465_v2 }
 0x1d0   :  { %1362 = vmatmul.mubr.msk.bf16.vlgmr.msra.gmra.mxu1 %vm95_vm0, %v1647_v7  ;;  %1370 = vmatmul.mubr.msk.bf16.vlgmr.msra.gmra.mxu0 %vm95_vm0, %v1661_v9 }
 0x1d1   :  { %1374 = vmatpush3.bf16.msra.mxu1 %v1463_v0  ;;  %1377 = vmatprep.mubr.msk.bf16.mxu1 %vm95_vm0, %v431_v63  ;;  %v1478_v63 = vld [vmem:[#allocation5 + $0x48] sm:$0xff]   ;;  %v1479_v0 = vld [vmem:[#allocation5] sm:$0xff]  }
 0x1d2   :  { %1375 = vmatprep.subr.bf16.mxu1 %v1464_v1  ;;  %1382 = vmatpush3.bf16.msra.mxu0 %v1465_v2 }
 0x1d3   :  { %1383 = vmatprep.subr.bf16.mxu0 %v1467_v4 }
 0x1d5   :  { %1376 = vmatpush3.bf16.msra.mxu1 %v1464_v1  ;;  %v1480_v1 = vld [vmem:[#allocation5 + $0x40] sm:$0xff]  }
 0x1d6   :  { %1389 = vmatprep.subr.bf16.mxu1 %v1466_v3  ;;  %1384 = vmatpush3.bf16.msra.mxu0 %v1467_v4 }
 0x1d8   :  { %1378 = vmatmul.mubr.msk.bf16.vlgmr.msra.gmra.mxu1 %vm95_vm0, %v432_v61  ;;  %v1472_v61 = vld [vmem:[#allocation5 + $0x20] sm:$0xff]  }
 0x1d9   :  { %1390 = vmatpush3.bf16.msra.mxu1 %v1466_v3 }
 0x1da   :  { %1391 = vmatprep.subr.bf16.mxu1 %v1468_v5 }
 0x1dd   :  { %1392 = vmatpush3.bf16.msra.mxu1 %v1468_v5 }
 0x290   :  { %v1363_v10 = vpop.f32.mrf.mxu1  ;;  %v1371_v11 = vpop.f32.mrf.mxu0 }
 0x292   :  { %v467_v12 = vpop.f32.mrf.mxu1  ;;  %v518_v13 = vpop.f32.mrf.mxu0 }
 0x294   :  { %v1364_v14 = vpop.f32.mrf.mxu1  ;;  %v1372_v15 = vpop.f32.mrf.mxu0 }
 0x295   :  { %v483_v20 = vpack.c.bf16 %v1364_v14, %v1363_v10  ;;  %v534_v21 = vpack.c.bf16 %v1372_v15, %v1371_v11 }
 0x296   :  { %v470_v16 = vpop.f32.mrf.mxu1  ;;  %v521_v17 = vpop.f32.mrf.mxu0 }
 0x297   :  { %v482_v18 = vpack.c.bf16 %v470_v16, %v467_v12  ;;  %v533_v19 = vpack.c.bf16 %v521_v17, %v518_v13 }
 0x298   :  { %v1379_v22 = vpop.f32.mrf.mxu1 }
 0x299   :  { %1385 = vmatprep.mubr.msk.bf16.mxu0 %vm95_vm0, %v482_v18  ;;  %1393 = vmatprep.mubr.msk.bf16.mxu1 %vm95_vm0, %v533_v19 }
 0x29a   :  { %1386 = vmatmul.mubr.msk.bf16.vlgmr.msra.gmra.mxu0 %vm95_vm0, %v483_v20  ;;  %1394 = vmatmul.mubr.msk.bf16.vlgmr.msra.gmra.mxu1 %vm95_vm0, %v534_v21  ;;  %v596_v23 = vpop.f32.mrf.mxu1 }
 0x29b   :  { %1401 = vmatprep.mubr.msk.bf16.mxu0 %vm95_vm0, %v1640_v6  ;;  %1409 = vmatprep.mubr.msk.bf16.mxu1 %vm95_vm0, %v1652_v8 }
 0x29c   :  { %v1380_v24 = vpop.f32.mrf.mxu1 }
 0x29e   :  { %v599_v25 = vpop.f32.mrf.mxu1 }
 0x35a   :  { %v1387_v26 = vpop.f32.mrf.mxu0  ;;  %v1395_v27 = vpop.f32.mrf.mxu1 }
 0x35b   :  { %v672_v28 = vadd.f32 %v1387_v26, %v1379_v22 }
 0x35c   :  { %v663_v30 = vpop.f32.mrf.mxu0  ;;  %v735_v31 = vpop.f32.mrf.mxu1 }
 0x35d   :  { %v752_v32 = vadd.f32 %v1395_v27, %v672_v28  ;;  %v664_v33 = vadd.f32 %v663_v30, %v596_v23  ;;  %v1259_v30 = vld [vmem:[%s1740_s11] ss:$0 sm:$0xff] }
 0x35e   :  { %v1388_v34 = vpop.f32.mrf.mxu0  ;;  %v1396_v6 = vpop.f32.mrf.mxu1 }
 0x35f   :  { %v763_v35 = vmul.f32 %v1234_v29, %v752_v32  ;;  %v750_v36 = vadd.f32 %v735_v31, %v664_v33  ;;  %v675_v8 = vadd.f32 %v1388_v34, %v1380_v24 }
 0x360   :  { %v666_v38 = vpop.f32.mrf.mxu0  ;;  %v738_v42 = vpop.f32.mrf.mxu1 }
 0x361   :  { %v761_v39 = vmul.f32 %v1234_v29, %v750_v36  ;;  %v753_v40 = vadd.f32 %v1396_v6, %v675_v8  ;;  %v667_v41 = vadd.f32 %v666_v38, %v599_v25  ;;  %v774_v43 = vadd.f32 %v1235_v37, %v763_v35  ;;  %v1258_v25 = vld [vmem:[%s1739_s10] ss:$0 sm:$0xff]  ;;  %s1551_s10 = smov [#allocation7]  }
 0x362   :  { %s1187_s11 = sshll.u32 %s1551_s10, 4  ;;  %s1188_s11 = int_to_ptr.vmem [resolvable:$true] %s1187_s11 }
 0x363   :  { %v764_v44 = vmul.f32 %v1234_v29, %v753_v40  ;;  %v751_v45 = vadd.f32 %v738_v42, %v667_v41  ;;  %v772_v46 = vadd.f32 %v1235_v37, %v761_v39  ;;  %v778_v49 = vmax.f32 %v774_v43, 0.0  ;;  %s1521_s20 = scalar_lea.vmem %s1188_s11, 512  ;;  %p1526_p11 = scmp.lt.s32.totalorder %s1188_s11, %s1188_s11 }
 0x364   :  { %p1522_p10 = scmp.ne.s32.totalorder %s1188_s11, %s1521_s20  ;;  %p1527_p12 = scmp.lt.s32.totalorder %s1521_s20, %s1521_s20 }
 0x365   :  { %v775_v47 = vadd.f32 %v1235_v37, %v764_v44  ;;  %v762_v48 = vmul.f32 %v1234_v29, %v751_v45  ;;  %v776_v52 = vmax.f32 %v772_v46, 0.0 }
 0x366   :  { %p1528_p13 = por %p1527_p12, %p1526_p11 }
 0x367   :  { %v779_v50 = vmax.f32 %v775_v47, 0.0  ;;  %v773_v51 = vadd.f32 %v1235_v37, %v762_v48 }
 0x368   :  { %p1529_p0 = pnand %p1528_p13, %p1522_p10 }
 0x369   :  { %v781_v53 = vpack.c.bf16 %v779_v50, %v778_v49  ;;  %v777_v54 = vmax.f32 %v773_v51, 0.0 }
 0x36b   :  { %v780_v55 = vpack.c.bf16 %v777_v54, %v776_v52  ;;  %1397 = vmatprep.subr.bf16.mxu0 %v781_v53  ;;  %1405 = vmatprep.subr.bf16.mxu1 %v781_v53 }
 0x36c   :  { %1398 = vmatpush3.bf16.msra.mxu0 %v781_v53  ;;  %1406 = vmatpush3.bf16.msra.mxu1 %v781_v53 }
 0x36d   :  { %1399 = vmatprep.subr.bf16.mxu0 %v780_v55  ;;  %1407 = vmatprep.subr.bf16.mxu1 %v780_v55 }
 0x370   :  { %1400 = vmatpush3.bf16.msra.mxu0 %v780_v55  ;;  %1408 = vmatpush3.bf16.msra.mxu1 %v780_v55 }
 0x371   :  { %1413 = vmatprep.subr.bf16.mxu0 %v1469_v56  ;;  %1425 = vmatprep.subr.bf16.mxu1 %v1473_v57 }
 0x373   :  { %1402 = vmatmul.mubr.msk.bf16.vlgmr.msra.gmra.mxu0 %vm95_vm0, %v1647_v7  ;;  %1410 = vmatmul.mubr.msk.bf16.vlgmr.msra.gmra.mxu1 %vm95_vm0, %v1661_v9  ;;  %v1476_v7 = vld [vmem:[#allocation5 + $0x50] sm:$0xff]   ;;  %v1477_v9 = vld [vmem:[#allocation5 + $0x8] sm:$0xff]  }
 0x374   :  { %1414 = vmatpush3.bf16.msra.mxu0 %v1469_v56  ;;  %1421 = vmatprep.mubr.msk.bf16.mxu0 %vm925_vm3, %v780_v55 }
 0x375   :  { %1415 = vmatprep.subr.bf16.mxu0 %v1470_v58  ;;  %1426 = vmatpush3.bf16.msra.mxu1 %v1473_v57 }
 0x376   :  { %1427 = vmatprep.subr.bf16.mxu1 %v1475_v59 }
 0x378   :  { %1416 = vmatpush3.bf16.msra.mxu0 %v1470_v58 }
 0x379   :  { %1417 = vmatprep.subr.bf16.mxu0 %v1471_v60  ;;  %1428 = vmatpush3.bf16.msra.mxu1 %v1475_v59 }
 0x37a   :  { %1429 = vmatprep.subr.bf16.mxu1 %v1477_v9 }
 0x37c   :  { %1418 = vmatpush3.bf16.msra.mxu0 %v1471_v60 }
 0x37d   :  { %1419 = vmatprep.subr.bf16.mxu0 %v1472_v61  ;;  %1430 = vmatpush3.bf16.msra.mxu1 %v1477_v9 }
 0x37e   :  { %1431 = vmatprep.subr.bf16.mxu1 %v1479_v0 }
 0x380   :  { %1420 = vmatpush3.bf16.msra.mxu0 %v1472_v61 }
 0x381   :  { %1437 = vmatprep.subr.bf16.mxu0 %v1474_v62  ;;  %1432 = vmatpush3.bf16.msra.mxu1 %v1479_v0 }
 0x383   :  { %1422 = vmatmul.mubr.msk.bf16.vlgmr.msra.gmra.mxu0 %vm925_vm3, %v781_v53 }
 0x384   :  { %1438 = vmatpush3.bf16.msra.mxu0 %v1474_v62 }
 0x385   :  { %1439 = vmatprep.subr.bf16.mxu0 %v1476_v7 }
 0x388   :  { %1440 = vmatpush3.bf16.msra.mxu0 %v1476_v7 }
 0x389   :  { %1441 = vmatprep.subr.bf16.mxu0 %v1478_v63 }
 0x38c   :  { %1442 = vmatpush3.bf16.msra.mxu0 %v1478_v63 }
 0x38d   :  { %1443 = vmatprep.subr.bf16.mxu0 %v1480_v1 }
 0x390   :  { %1444 = vmatpush3.bf16.msra.mxu0 %v1480_v1 }
 0x433   :  { %v1403_v2 = vpop.f32.mrf.mxu0  ;;  %v1411_v3 = vpop.f32.mrf.mxu1 }
 0x435   :  { %v816_v4 = vpop.f32.mrf.mxu0  ;;  %v867_v5 = vpop.f32.mrf.mxu1 }
 0x437   :  { %v1404_v10 = vpop.f32.mrf.mxu0  ;;  %v1412_v11 = vpop.f32.mrf.mxu1 }
 0x438   :  { %v832_v16 = vpack.c.bf16 %v1404_v10, %v1403_v2  ;;  %v883_v17 = vpack.c.bf16 %v1412_v11, %v1411_v3 }
 0x439   :  { %v819_v12 = vpop.f32.mrf.mxu0  ;;  %v870_v13 = vpop.f32.mrf.mxu1 }
 0x43a   :  { %v831_v14 = vpack.c.bf16 %v819_v12, %v816_v4  ;;  %v882_v15 = vpack.c.bf16 %v870_v13, %v867_v5 }
 0x43c   :  { %1433 = vmatprep.mubr.msk.bf16.mxu1 %vm925_vm3, %v831_v14  ;;  %1445 = vmatprep.mubr.msk.bf16.mxu0 %vm925_vm3, %v882_v15 }
 0x43d   :  { %1434 = vmatmul.mubr.msk.bf16.vlgmr.msra.gmra.mxu1 %vm925_vm3, %v832_v16  ;;  %1446 = vmatmul.mubr.msk.bf16.vlgmr.msra.gmra.mxu0 %vm925_vm3, %v883_v17 }
 0x443   :  { %v1423_v18 = vpop.f32.mrf.mxu0 }
 0x445   :  { %v966_v19 = vpop.f32.mrf.mxu0 }
 0x447   :  { %v1424_v20 = vpop.f32.mrf.mxu0 }
 0x449   :  { %v969_v21 = vpop.f32.mrf.mxu0 }
 0x4fd   :  { %v1435_v22 = vpop.f32.mrf.mxu1  ;;  %v1447_v23 = vpop.f32.mrf.mxu0 }
 0x4fe   :  { %v1054_v24 = vadd.f32 %v1435_v22, %v1423_v18 }
 0x4ff   :  { %v1045_v26 = vpop.f32.mrf.mxu1  ;;  %v1133_v27 = vpop.f32.mrf.mxu0 }
 0x500   :  { %v1150_v28 = vadd.f32 %v1447_v23, %v1054_v24  ;;  %v1046_v29 = vadd.f32 %v1045_v26, %v966_v19 }
 0x501   :  { %v1436_v31 = vpop.f32.mrf.mxu1  ;;  %v1448_v32 = vpop.f32.mrf.mxu0 }
 0x502   :  { %v1161_v33 = vmul.f32 %v1258_v25, %v1150_v28  ;;  %v1148_v34 = vadd.f32 %v1133_v27, %v1046_v29  ;;  %v1057_v6 = vadd.f32 %v1436_v31, %v1424_v20 }
 0x503   :  { %v1048_v35 = vpop.f32.mrf.mxu1  ;;  %v1136_v39 = vpop.f32.mrf.mxu0 }
 0x504   :  { %v1172_v36 = vadd.f32 %v1259_v30, %v1161_v33  ;;  %v1159_v8 = vmul.f32 %v1258_v25, %v1148_v34  ;;  %v1151_v37 = vadd.f32 %v1448_v32, %v1057_v6  ;;  %v1049_v38 = vadd.f32 %v1048_v35, %v969_v21 }
 0x506   :  { %v1176_v40 = vmax.f32 %v1172_v36, 0.0  ;;  %v1170_v41 = vadd.f32 %v1259_v30, %v1159_v8  ;;  %v1162_v42 = vmul.f32 %v1258_v25, %v1151_v37  ;;  %v1149_v43 = vadd.f32 %v1136_v39, %v1049_v38 }
 0x508   :  { %1180 = vst [vmem:[#allocation7 + $0x10] sm:$0xff] %v1176_v40  ;;  %v1174_v44 = vmax.f32 %v1170_v41, 0.0  ;;  %v1173_v45 = vadd.f32 %v1259_v30, %v1162_v42  ;;  %v1160_v46 = vmul.f32 %v1258_v25, %v1149_v43 }
 0x50a   :  { %1178 = vst [vmem:[#allocation7] sm:$0xff] %v1174_v44  ;;  %v1177_v47 = vmax.f32 %v1173_v45, 0.0  ;;  %v1171_v48 = vadd.f32 %v1259_v30, %v1160_v46 }
 0x50c   :  { %1181 = vst [vmem:[#allocation7 + $0x18] sm:$0xff] %v1177_v47  ;;  %v1175_v49 = vmax.f32 %v1171_v48, 0.0 }
 0x50e   :  { %1179 = vst [vmem:[#allocation7 + $0x8] sm:$0xff] %v1175_v49 }
 0x50f   :  { %1532 = shalt.err (!%p1529_p0)
}
 0x510   :  { %s1552_s21 = smov 128   ;;  %s1553_s9 = smov 8  }
 0x511   :  { %1193 = dma.vmem_to_hbm [thread:$0]  %s1188_s11, 512, %s1741_s12, [#allocation4], %s1552_s21, %s1552_s21, %s1553_s9  }
 0x512   :  { %1545 = dma.done.wait [#allocation4], 512  }
 0x513   :  { %1546 = vsyncadd [#allocation4], 4294966784 }
 0x514   :  { %1197 = vsyncpa [#allocation3], 1 }
 0x515   :  { %1198 = vsyncpa [#allocation6], 1 }
 0x516   :  { %1199 = vsyncpa [#allocation4], 1 }

</bundles_post_ra>
